<compile_context>
chip_gen: v7x
topology: tpu7x:2x2x1
jax: 0.10.0
libtpu: 0.0.40
codegen_flags: <defaults>
</compile_context>

<pallas_src>
import jax
import jax.numpy as jnp
from jax.experimental import pallas as pl
from jax.experimental.pallas import tpu as pltpu

N_OUT = 5  # fixed by the module: Linear(embdim, 5)


def _round_up(x, m):
    return (x + m - 1) // m * m


def _mlp_head_kernel(x_ref, w1_ref, b1_ref, w2_ref, b2_ref, w3_ref, b3_ref, o_ref):
    """One row-tile of the 3-layer MLP head. Weights/biases are resident VMEM blocks."""
    x = x_ref[...]
    h = jnp.dot(x, w1_ref[...], preferred_element_type=jnp.float32) + b1_ref[...]
    h = jnp.maximum(h, 0.0)                                   # ReLU(inplace=True)
    h = h.astype(w2_ref.dtype)                                # keep MXU in bf16
    h = jnp.dot(h, w2_ref[...], preferred_element_type=jnp.float32) + b2_ref[...]
    h = jnp.maximum(h, 0.0)                                   # ReLU(inplace=True)
    h = h.astype(w3_ref.dtype)
    out = jnp.dot(h, w3_ref[...], preferred_element_type=jnp.float32) + b3_ref[...]
    o_ref[...] = out.astype(o_ref.dtype)


def _pick_row_tile(m, max_tm=512):
    """Row tile (multiple of 8, up to 512) and padded row count (multiple of tile)."""
    m8 = _round_up(max(m, 8), 8)
    tm = min(max_tm, m8)
    # Keep >=2 row tiles for big batches so ("parallel",) shards across both v7x
    # TensorCores; never shrink below 128 (grid-step overhead dominates earlier).
    while tm > 128 and m8 // tm < 2:
        tm //= 2
    return tm, _round_up(m8, tm)


def mlp_head(x_rows, padded_params, tm):
    """x_rows: [m_pad, d_in] (m_pad % tm == 0) -> [m_pad, n_pad] in the weight dtype."""
    w1, b1, w2, b2, w3, b3 = padded_params
    m_pad, d_in = x_rows.shape
    assert d_in == w1.shape[0] and m_pad % tm == 0
    n_pad = w3.shape[1]

    def const_spec(a):  # resident across the whole grid -> single-buffered
        return pl.BlockSpec(a.shape, lambda i: (0,) * a.ndim,
                            pipeline_mode=pl.Buffered(1))

    # TODO(synk): for very large resident weights without K-tiling, also raise
    # pltpu.CompilerParams(vmem_limit_bytes=...) (defaults ~16/32/32 MiB scoped
    # on v5e/v6e/v7x); unnecessary at these demo sizes.
    return pl.pallas_call(
        _mlp_head_kernel,
        out_shape=jax.ShapeDtypeStruct((m_pad, n_pad), w1.dtype),
        grid=(m_pad // tm,),
        in_specs=[
            pl.BlockSpec((tm, d_in), lambda i: (i, 0)),  # streamed x row tile (K unpadded)
            const_spec(w1), const_spec(b1), const_spec(w2),
            const_spec(b2), const_spec(w3), const_spec(b3),
        ],
        out_specs=pl.BlockSpec((tm, n_pad), lambda i: (i, 0)),  # lane-dense 128-wide
        compiler_params=pltpu.CompilerParams(
            dimension_semantics=("parallel",)),
    )(x_rows, w1, b1, w2, b2, w3, b3)


def siamese_forward(inputs_nchw, padded_params, n_out=N_OUT):
    """Mirror SiameseNetwork.forward(*inputs): list of per-input [B, n_out] f32 outputs.

    All inputs are flattened, cast to the matmul dtype and stacked (together with
    any zero row padding) in a single concatenate, so the whole siamese pass is
    one pallas_call and the weights are DMA'd to VMEM exactly once.
    """
    w1 = padded_params[0]
    dtype = w1.dtype
    d_in = w1.shape[0]
    flats = [x.reshape(x.shape[0], -1).astype(dtype) for x in inputs_nchw]
    m = sum(f.shape[0] for f in flats)
    tm, m_pad = _pick_row_tile(m)
    if m_pad > m:
        flats.append(jnp.zeros((m_pad - m, d_in), dtype))
    # TODO(synk): a zero-copy variant would feed each input through its own
    #             BlockSpec covering a disjoint row range instead of concatenating.
    x_all = jnp.concatenate(flats, axis=0)            # [m_pad, d_in], single copy
    out_all = mlp_head(x_all, padded_params, tm)      # [m_pad, n_pad]

    outs, start = [], 0
    for x in inputs_nchw:
        b = x.shape[0]
        outs.append(out_all[start:start + b, :n_out].astype(jnp.float32))
        start += b
    return outs


def init_params(key, d_in, embdim, n_out=N_OUT):
    """Unpadded, PyTorch-Linear-style f32 params (reference weights)."""
    k1, k2, k3, k4, k5, k6 = jax.random.split(key, 6)

    def lin(kw, kb, fan_in, fan_out):
        bound = 1.0 / (fan_in ** 0.5)
        w = jax.random.uniform(kw, (fan_in, fan_out), jnp.float32, -bound, bound)
        b = jax.random.uniform(kb, (1, fan_out), jnp.float32, -bound, bound)
        return w, b

    w1, b1 = lin(k1, k2, d_in, embdim)
    w2, b2 = lin(k3, k4, embdim, embdim)
    w3, b3 = lin(k5, k6, embdim, n_out)
    return (w1, b1, w2, b2, w3, b3)


def pad_params(params, dtype=jnp.bfloat16):
    """Zero-pad embdim / n_out to multiples of 128 (lane-dense) and cast the matmul
    operands to `dtype` (bf16 = MXU-native).  The contraction dim (d_in) is NOT
    padded.  Biases stay f32 (added onto the f32 accumulator)."""
    w1, b1, w2, b2, w3, b3 = params
    emb = w1.shape[1]
    n_out = w3.shape[1]
    e_pad = _round_up(emb, 128)
    n_pad = _round_up(n_out, 128)

    def pad2(a, rows, cols):
        return jnp.pad(a, ((0, rows - a.shape[0]), (0, cols - a.shape[1])))

    w1p = pad2(w1, w1.shape[0], e_pad).astype(dtype)   # [d_in, e_pad], K unpadded
    w2p = pad2(w2, e_pad, e_pad).astype(dtype)
    w3p = pad2(w3, e_pad, n_pad).astype(dtype)
    b1p = pad2(b1, 1, e_pad)   # f32
    b2p = pad2(b2, 1, e_pad)   # f32
    b3p = pad2(b3, 1, n_pad)   # f32
    return (w1p, b1p, w2p, b2p, w3p, b3p)


if __name__ == "__main__":
    key = jax.random.PRNGKey(0)
    # Small shapes consistent with the end_layer=7 branch (C*7*7 feature maps),
    # scaled down: B=2, C=16, H=W=7 -> D_in = 784 ; embdim = 64 ; out = 5.
    B, C, H, W = 2, 16, 7, 7
    embdim = 64
    d_in = C * H * W

    kx1, kx2, kp = jax.random.split(key, 3)
    x1 = jax.random.normal(kx1, (B, C, H, W), jnp.float32)
    x2 = jax.random.normal(kx2, (B, C, H, W), jnp.float32)

    params = init_params(kp, d_in, embdim)
    padded = pad_params(params, dtype=jnp.bfloat16)   # bf16 MXU operands, f32 accum

    outs = siamese_forward([x1, x2], padded)
    outs = [jax.block_until_ready(o) for o in outs]

    # Reference: same math with identically bf16-rounded operands, f32 accumulation.
    def ref_head(x):
        w1, b1, w2, b2, w3, b3 = params
        bf = lambda a: a.astype(jnp.bfloat16).astype(jnp.float32)
        h = jnp.maximum(bf(x.reshape(x.shape[0], -1)) @ bf(w1) + b1, 0.0)
        h = jnp.maximum(bf(h) @ bf(w2) + b2, 0.0)
        return bf(h) @ bf(w3) + b3

    for x, o in zip([x1, x2], outs):
        assert o.shape == (B, N_OUT) and o.dtype == jnp.float32
        ref = ref_head(x)
        assert jnp.allclose(o, ref, atol=1e-2, rtol=1e-2), \
            float(jnp.max(jnp.abs(o - ref)))

    print("KERNEL_OK")
</pallas_src>

<mosaic_0001>
module attributes {stable_mosaic.version = 11 : i64} {
  func.func @_mlp_head_kernel(%arg0: i32, %arg1: memref<8x784xbf16, #tpu.memory_space<vmem>>, %arg2: memref<784x128xbf16, #tpu.memory_space<vmem>>, %arg3: memref<1x128xf32, #tpu.memory_space<vmem>>, %arg4: memref<128x128xbf16, #tpu.memory_space<vmem>>, %arg5: memref<1x128xf32, #tpu.memory_space<vmem>>, %arg6: memref<128x128xbf16, #tpu.memory_space<vmem>>, %arg7: memref<1x128xf32, #tpu.memory_space<vmem>>, %arg8: memref<8x128xbf16, #tpu.memory_space<vmem>>) attributes {dimension_semantics = [#tpu.dimension_semantics<parallel>], iteration_bounds = array<i64: 1>, scalar_prefetch = 0 : i64, scratch_operands = 0 : i64, tpu.core_type = #tpu.core_type<tc>, window_params = [{transform_indices = @transform_0, window_bounds = array<i64: 8, 784>}, {pipeline_mode = #tpu.pipeline_mode<synchronous>, transform_indices = @transform_1, window_bounds = array<i64: 784, 128>}, {pipeline_mode = #tpu.pipeline_mode<synchronous>, transform_indices = @transform_2, window_bounds = array<i64: 1, 128>}, {pipeline_mode = #tpu.pipeline_mode<synchronous>, transform_indices = @transform_3, window_bounds = array<i64: 128, 128>}, {pipeline_mode = #tpu.pipeline_mode<synchronous>, transform_indices = @transform_4, window_bounds = array<i64: 1, 128>}, {pipeline_mode = #tpu.pipeline_mode<synchronous>, transform_indices = @transform_5, window_bounds = array<i64: 128, 128>}, {pipeline_mode = #tpu.pipeline_mode<synchronous>, transform_indices = @transform_6, window_bounds = array<i64: 1, 128>}, {transform_indices = @transform_7, window_bounds = array<i64: 8, 128>}]} {
    %c0 = arith.constant 0 : index
    %c0_0 = arith.constant 0 : index
    %0 = vector.load %arg1[%c0, %c0_0] : memref<8x784xbf16, #tpu.memory_space<vmem>>, vector<8x784xbf16>
    %c0_1 = arith.constant 0 : index
    %c0_2 = arith.constant 0 : index
    %1 = vector.load %arg2[%c0_1, %c0_2] : memref<784x128xbf16, #tpu.memory_space<vmem>>, vector<784x128xbf16>
    %cst = arith.constant dense<0.000000e+00> : vector<8x128xf32>
    %2 = tpu.matmul %0, %1, %cst {dimension_numbers = #tpu.dot_dimension_numbers<[1], [0], [0], [1], [0, 0, 1, 1], [], []>} : vector<8x784xbf16>, vector<784x128xbf16>, vector<8x128xf32> -> vector<8x128xf32>
    %c0_3 = arith.constant 0 : index
    %c0_4 = arith.constant 0 : index
    %3 = vector.load %arg3[%c0_3, %c0_4] : memref<1x128xf32, #tpu.memory_space<vmem>>, vector<1x128xf32>
    %4 = vector.broadcast %3 : vector<1x128xf32> to vector<8x128xf32>
    %5 = arith.addf %2, %4 : vector<8x128xf32>
    %cst_5 = arith.constant 0.000000e+00 : f32
    %6 = vector.broadcast %cst_5 : f32 to vector<8x128xf32>
    %7 = arith.maximumf %5, %6 : vector<8x128xf32>
    %8 = arith.truncf %7 : vector<8x128xf32> to vector<8x128xbf16>
    %c0_6 = arith.constant 0 : index
    %c0_7 = arith.constant 0 : index
    %9 = vector.load %arg4[%c0_6, %c0_7] : memref<128x128xbf16, #tpu.memory_space<vmem>>, vector<128x128xbf16>
    %cst_8 = arith.constant dense<0.000000e+00> : vector<8x128xf32>
    %10 = tpu.matmul %8, %9, %cst_8 {dimension_numbers = #tpu.dot_dimension_numbers<[1], [0], [0], [1], [0, 0, 1, 1], [], []>} : vector<8x128xbf16>, vector<128x128xbf16>, vector<8x128xf32> -> vector<8x128xf32>
    %c0_9 = arith.constant 0 : index
    %c0_10 = arith.constant 0 : index
    %11 = vector.load %arg5[%c0_9, %c0_10] : memref<1x128xf32, #tpu.memory_space<vmem>>, vector<1x128xf32>
    %12 = vector.broadcast %11 : vector<1x128xf32> to vector<8x128xf32>
    %13 = arith.addf %10, %12 : vector<8x128xf32>
    %cst_11 = arith.constant 0.000000e+00 : f32
    %14 = vector.broadcast %cst_11 : f32 to vector<8x128xf32>
    %15 = arith.maximumf %13, %14 : vector<8x128xf32>
    %16 = arith.truncf %15 : vector<8x128xf32> to vector<8x128xbf16>
    %c0_12 = arith.constant 0 : index
    %c0_13 = arith.constant 0 : index
    %17 = vector.load %arg6[%c0_12, %c0_13] : memref<128x128xbf16, #tpu.memory_space<vmem>>, vector<128x128xbf16>
    %cst_14 = arith.constant dense<0.000000e+00> : vector<8x128xf32>
    %18 = tpu.matmul %16, %17, %cst_14 {dimension_numbers = #tpu.dot_dimension_numbers<[1], [0], [0], [1], [0, 0, 1, 1], [], []>} : vector<8x128xbf16>, vector<128x128xbf16>, vector<8x128xf32> -> vector<8x128xf32>
    %c0_15 = arith.constant 0 : index
    %c0_16 = arith.constant 0 : index
    %19 = vector.load %arg7[%c0_15, %c0_16] : memref<1x128xf32, #tpu.memory_space<vmem>>, vector<1x128xf32>
    %20 = vector.broadcast %19 : vector<1x128xf32> to vector<8x128xf32>
    %21 = arith.addf %18, %20 : vector<8x128xf32>
    %22 = arith.truncf %21 : vector<8x128xf32> to vector<8x128xbf16>
    %c0_17 = arith.constant 0 : index
    %c0_18 = arith.constant 0 : index
    %23 = vector.load %arg8[%c0_17, %c0_18] : memref<8x128xbf16, #tpu.memory_space<vmem>>, vector<8x128xbf16>
    tpu.vector_store %arg8[%c0_17, %c0_18], %22 {strides = array<i32>} : memref<8x128xbf16, #tpu.memory_space<vmem>>, vector<8x128xbf16>,
    return
  }
  func.func @transform_0(%arg0: i32) -> (i32, i32) {
    %c0_i32 = arith.constant 0 : i32
    %c0_i32_0 = arith.constant 0 : i32
    return %arg0, %c0_i32 : i32, i32
  }
  func.func @transform_1(%arg0: i32) -> (i32, i32) {
    %c0_i32 = arith.constant 0 : i32
    %c0_i32_0 = arith.constant 0 : i32
    %c0_i32_1 = arith.constant 0 : i32
    return %c0_i32, %c0_i32_0 : i32, i32
  }
  func.func @transform_2(%arg0: i32) -> (i32, i32) {
    %c0_i32 = arith.constant 0 : i32
    %c0_i32_0 = arith.constant 0 : i32
    %c0_i32_1 = arith.constant 0 : i32
    return %c0_i32, %c0_i32_0 : i32, i32
  }
  func.func @transform_3(%arg0: i32) -> (i32, i32) {
    %c0_i32 = arith.constant 0 : i32
    %c0_i32_0 = arith.constant 0 : i32
    %c0_i32_1 = arith.constant 0 : i32
    return %c0_i32, %c0_i32_0 : i32, i32
  }
  func.func @transform_4(%arg0: i32) -> (i32, i32) {
    %c0_i32 = arith.constant 0 : i32
    %c0_i32_0 = arith.constant 0 : i32
    %c0_i32_1 = arith.constant 0 : i32
    return %c0_i32, %c0_i32_0 : i32, i32
  }
  func.func @transform_5(%arg0: i32) -> (i32, i32) {
    %c0_i32 = arith.constant 0 : i32
    %c0_i32_0 = arith.constant 0 : i32
    %c0_i32_1 = arith.constant 0 : i32
    return %c0_i32, %c0_i32_0 : i32, i32
  }
  func.func @transform_6(%arg0: i32) -> (i32, i32) {
    %c0_i32 = arith.constant 0 : i32
    %c0_i32_0 = arith.constant 0 : i32
    %c0_i32_1 = arith.constant 0 : i32
    return %c0_i32, %c0_i32_0 : i32, i32
  }
  func.func @transform_7(%arg0: i32) -> (i32, i32) {
    %c0_i32 = arith.constant 0 : i32
    %c0_i32_0 = arith.constant 0 : i32
    return %arg0, %c0_i32 : i32, i32
  }
}

</mosaic_0001>

<bundles_post_ra>
// kernel: tpu_custom_call.1
= control target key start
LH: loop header
LB: loop body
LE: loop exit
PB: predicated region body
PF: predicated region fallthrough
CT: control target
= control target key end

     0   :  { %12 = vsyncpa [#allocation3], 0  ;;  %s1474_s0 = inlined_call_operand.hbm [shape: bf16[8,784], index: 0, kind: input, shape index: {}]   ;;  %s1475_s1 = inlined_call_operand.hbm [shape: bf16[784,128], index: 1, kind: input, shape index: {}]   ;;  %s1476_s2 = inlined_call_operand.vmem [shape: f32[1,128], index: 2, kind: input, shape index: {}]   ;;  %s1477_s3 = inlined_call_operand.hbm [shape: bf16[128,128], index: 3, kind: input, shape index: {}]   ;;  %s1478_s4 = inlined_call_operand.vmem [shape: f32[1,128], index: 4, kind: input, shape index: {}]   ;;  %s1479_s5 = inlined_call_operand.hbm [shape: bf16[128,128], index: 5, kind: input, shape index: {}]   ;;  %s1480_s6 = inlined_call_operand.vmem [shape: f32[1,128], index: 6, kind: input, shape index: {}]   ;;  %s1481_s7 = inlined_call_operand.hbm [shape: bf16[8,128], index: 7, kind: output, shape index: {}]  }
   0x1   :  { %13 = vsyncpa [#allocation6], 0 }
   0x2   :  { %14 = vsyncpa [#allocation9], 0 }
   0x3   :  { %15 = vsyncpa [#allocation4], 0  ;;  %s1324_s24 = smov [#allocation5]   ;;  %s1206_s28 = scalar_lea.hbm %s1475_s1, 6272 }
   0x4   :  { %s31_s25 = sshll.u32 %s1324_s24, 4  ;;  %p1207_p0 = scmp.ne.s32.totalorder %s1475_s1, %s1206_s28  ;;  %s32_s25 = int_to_ptr.vmem [resolvable:$true] %s31_s25 }
   0x5   :  { %p1210_p1 = scmp.lt.u32.totalorder %s1206_s28, %s1475_s1 }
   0x7   :  { %p1212_p2 = pnand %p1210_p1, %p1207_p0 }
   0x9   :  { %1215 = shalt.err (!%p1212_p2)
}
   0xa   :  { %s1216_s10 = scalar_lea.vmem %s32_s25, 6272  ;;  %p1221_p4 = scmp.lt.s32.totalorder %s32_s25, %s32_s25 }
   0xb   :  { %p1217_p3 = scmp.ne.s32.totalorder %s32_s25, %s1216_s10  ;;  %p1222_p5 = scmp.lt.s32.totalorder %s1216_s10, %s1216_s10 }
   0xd   :  { %p1223_p6 = por %p1222_p5, %p1221_p4 }
   0xf   :  { %p1224_p7 = pnand %p1223_p6, %p1217_p3 }
  0x11   :  { %1227 = shalt.err (!%p1224_p7)
}
  0x12   :  { %s1325_s11 = smov 64   ;;  %s1326_s12 = smov 4  }
  0x13   :  { %37 = dma.hbm_to_vmem [thread:$0]  %s1475_s1, 6272, %s32_s25, [#allocation6], %s1325_s11, %s1325_s11, %s1326_s12  }
  0x14   :  { %s1327_s15 = smov [#allocation2]   ;;  %s1328_s17 = smov [#allocation7]  }
  0x15   :  { %s22_s16 = sshll.u32 %s1327_s15, 4  ;;  %s45_s18 = sshll.u32 %s1328_s17, 4  ;;  %s23_s16 = int_to_ptr.vmem [resolvable:$true] %s22_s16  ;;  %s46_s18 = int_to_ptr.vmem [resolvable:$true] %s45_s18 }
  0x16   :  { %s1228_s21 = scalar_lea.hbm %s1474_s0, 448 }
  0x17   :  { %p1229_p8 = scmp.ne.s32.totalorder %s1474_s0, %s1228_s21  ;;  %p1232_p9 = scmp.lt.u32.totalorder %s1228_s21, %s1474_s0 }
  0x19   :  { %p1234_p10 = pnand %p1232_p9, %p1229_p8 }
  0x1b   :  { %1237 = shalt.err (!%p1234_p10)
}
  0x1c   :  { %s1238_s1 = scalar_lea.vmem %s23_s16, 448  ;;  %p1243_p12 = scmp.lt.s32.totalorder %s23_s16, %s23_s16 }
  0x1d   :  { %p1239_p11 = scmp.ne.s32.totalorder %s23_s16, %s1238_s1  ;;  %p1244_p13 = scmp.lt.s32.totalorder %s1238_s1, %s1238_s1 }
  0x1f   :  { %p1245_p0 = por %p1244_p13, %p1243_p12 }
  0x21   :  { %p1246_p1 = pnand %p1245_p0, %p1239_p11 }
  0x23   :  { %1249 = shalt.err (!%p1246_p1)
}
  0x24   :  { %25 = dma.hbm_to_vmem [thread:$0]  %s1474_s0, 448, %s23_s16, [#allocation3]  }
  0x25   :  { %s1250_s30 = scalar_lea.hbm %s1477_s3, 1024 }
  0x26   :  { %p1251_p2 = scmp.ne.s32.totalorder %s1477_s3, %s1250_s30  ;;  %p1254_p3 = scmp.lt.u32.totalorder %s1250_s30, %s1477_s3 }
  0x28   :  { %p1256_p4 = pnand %p1254_p3, %p1251_p2 }
  0x2a   :  { %1259 = shalt.err (!%p1256_p4)
}
  0x2b   :  { %s1260_s14 = scalar_lea.vmem %s46_s18, 1024  ;;  %p1265_p6 = scmp.lt.s32.totalorder %s46_s18, %s46_s18 }
  0x2c   :  { %p1261_p5 = scmp.ne.s32.totalorder %s46_s18, %s1260_s14  ;;  %p1266_p7 = scmp.lt.s32.totalorder %s1260_s14, %s1260_s14 }
  0x2e   :  { %p1267_p8 = por %p1266_p7, %p1265_p6 }
  0x30   :  { %p1268_p9 = pnand %p1267_p8, %p1261_p5 }
  0x32   :  { %1271 = shalt.err (!%p1268_p9)
}
  0x33   :  { %51 = dma.hbm_to_vmem [thread:$0]  %s1477_s3, 1024, %s46_s18, [#allocation6], %s1325_s11, %s1325_s11, %s1326_s12  }
  0x34   :  { %s1329_s16 = smov [#allocation8]   ;;  %s1272_s21 = scalar_lea.hbm %s1479_s5, 1024 }
  0x35   :  { %s59_s17 = sshll.u32 %s1329_s16, 4  ;;  %p1273_p10 = scmp.ne.s32.totalorder %s1479_s5, %s1272_s21  ;;  %s60_s17 = int_to_ptr.vmem [resolvable:$true] %s59_s17 }
  0x36   :  { %p1276_p11 = scmp.lt.u32.totalorder %s1272_s21, %s1479_s5 }
  0x38   :  { %p1278_p12 = pnand %p1276_p11, %p1273_p10 }
  0x3a   :  { %1281 = shalt.err (!%p1278_p12)
}
  0x3b   :  { %s1282_s1 = scalar_lea.vmem %s60_s17, 1024  ;;  %p1287_p0 = scmp.lt.s32.totalorder %s60_s17, %s60_s17 }
  0x3c   :  { %p1283_p13 = scmp.ne.s32.totalorder %s60_s17, %s1282_s1  ;;  %p1288_p1 = scmp.lt.s32.totalorder %s1282_s1, %s1282_s1 }
  0x3e   :  { %p1289_p2 = por %p1288_p1, %p1287_p0 }
  0x40   :  { %p1290_p3 = pnand %p1289_p2, %p1283_p13 }
  0x42   :  { %1293 = shalt.err (!%p1290_p3)
}
  0x43   :  { %65 = dma.hbm_to_vmem [thread:$0]  %s1479_s5, 1024, %s60_s17, [#allocation9], %s1325_s11, %s1325_s11, %s1326_s12  }
  0x44   :  { %1316 = dma.done.wait [#allocation3], 448  }
  0x45   :  { %1317 = vsyncadd [#allocation3], 4294966848 }
  0x46   :  { %1318 = dma.done.wait [#allocation6], 7296  }
  0x47   :  { %1319 = vsyncadd [#allocation6], 4294960000 }
  0x48   :  { %1320 = dma.done.wait [#allocation9], 1024  }
  0x49   :  { %1321 = vsyncadd [#allocation9], 4294966272  ;;  %v1134_v0 = vld [vmem:[#allocation5 + $0x40] sm:$0xff]   ;;  %v1138_v4 = vld [vmem:[#allocation5 + $0x48] sm:$0xff]   ;;  %v1330_v43 = vmov 0.0   ;;  %vm1331_vm0 = vmmov 0  }
  0x4a   :  { %v1135_v1 = vld [vmem:[#allocation5] sm:$0xff]   ;;  %993 = vmatprep.subr.bf16.mxu0 %v1134_v0  ;;  %v1139_v5 = vld [vmem:[#allocation5 + $0x8] sm:$0xff]   ;;  %v1142_v8 = vld [vmem:[#allocation5 + $0x50] sm:$0xff]   ;;  %vm508_vm1 = vcmask 130048   ;;  %s1332_s28 = smov [#allocation10]  }
  0x4b   :  { %v1136_v2 = vld [vmem:[#allocation5 + $0xc0] sm:$0xff]   ;;  %994 = vmatpush3.bf16.msra.mxu0 %v1135_v1  ;;  %v1140_v6 = vld [vmem:[#allocation5 + $0xc8] sm:$0xff]   ;;  %v1143_v9 = vld [vmem:[#allocation5 + $0x10] sm:$0xff]   ;;  %s906_s29 = sshll.u32 %s1332_s28, 4  ;;  %s907_s29 = int_to_ptr.vmem [resolvable:$true] %s906_s29 }
  0x4c   :  { %v1137_v3 = vld [vmem:[#allocation5 + $0x80] sm:$0xff]   ;;  %1015 = vmatprep.subr.bf16.mxu1 %v1136_v2  ;;  %995 = vmatprep.subr.bf16.mxu0 %v1138_v4  ;;  %v1141_v7 = vld [vmem:[#allocation5 + $0x88] sm:$0xff]   ;;  %v1144_v10 = vld [vmem:[#allocation5 + $0xd0] sm:$0xff]   ;;  %p1299_p5 = scmp.lt.s32.totalorder %s907_s29, %s907_s29 }
  0x4d   :  { %1016 = vmatpush3.bf16.msra.mxu1 %v1137_v3  ;;  %v1145_v11 = vld [vmem:[#allocation5 + $0x90] sm:$0xff]   ;;  %v1146_v12 = vld [vmem:[#allocation5 + $0x58] sm:$0xff]   ;;  %v1150_v16 = vld [vmem:[#allocation5 + $0x60] sm:$0xff]  }
  0x4e   :  { %1017 = vmatprep.subr.bf16.mxu1 %v1140_v6  ;;  %v1147_v13 = vld [vmem:[#allocation5 + $0x18] sm:$0xff]   ;;  %v1151_v17 = vld [vmem:[#allocation5 + $0x20] sm:$0xff]   ;;  %v1154_v20 = vld [vmem:[#allocation5 + $0x68] sm:$0xff]  }
  0x4f   :  { %996 = vmatpush3.bf16.msra.mxu0 %v1139_v5  ;;  %v1148_v14 = vld [vmem:[#allocation5 + $0xd8] sm:$0xff]   ;;  %v1152_v18 = vld [vmem:[#allocation5 + $0xe0] sm:$0xff]   ;;  %v1155_v21 = vld [vmem:[#allocation5 + $0x28] sm:$0xff]  }
  0x50   :  { %997 = vmatprep.subr.bf16.mxu0 %v1142_v8  ;;  %v1149_v15 = vld [vmem:[#allocation5 + $0x98] sm:$0xff]   ;;  %v1153_v19 = vld [vmem:[#allocation5 + $0xa0] sm:$0xff]   ;;  %v1156_v22 = vld [vmem:[#allocation5 + $0xe8] sm:$0xff]  }
  0x51   :  { %1018 = vmatpush3.bf16.msra.mxu1 %v1141_v7  ;;  %v1157_v23 = vld [vmem:[#allocation5 + $0xa8] sm:$0xff]   ;;  %v1158_v24 = vld [vmem:[#allocation5 + $0x70] sm:$0xff]   ;;  %v1162_v28 = vld [vmem:[#allocation5 + $0x78] sm:$0xff]  }
  0x52   :  { %1019 = vmatprep.subr.bf16.mxu1 %v1144_v10  ;;  %v1159_v25 = vld [vmem:[#allocation5 + $0x30] sm:$0xff]   ;;  %v1163_v29 = vld [vmem:[#allocation5 + $0x38] sm:$0xff]   ;;  %v81_v31 = vld [vmem:[#allocation2] sm:$0xff] }
  0x53   :  { %998 = vmatpush3.bf16.msra.mxu0 %v1143_v9  ;;  %v1160_v26 = vld [vmem:[#allocation5 + $0xf0] sm:$0xff]   ;;  %v1164_v30 = vld [vmem:[#allocation5 + $0xf8] sm:$0xff]   ;;  %v918_v32 = vcombine.low %v81_v31, %v81_v31  ;;  %v919_v33 = vcombine.high %v81_v31, %v81_v31  ;;  %v1168_v35 = vld [vmem:[#allocation5 + $0x140] sm:$0xff]  }
  0x54   :  { %999 = vmatprep.subr.bf16.mxu0 %v1146_v12  ;;  %v1161_v27 = vld [vmem:[#allocation5 + $0xb0] sm:$0xff]   ;;  %v1167_v34 = vld [vmem:[#allocation5 + $0xb8] sm:$0xff]   ;;  %v1171_v39 = vld [vmem:[#allocation5 + $0x100] sm:$0xff]  }
  0x55   :  { %1020 = vmatpush3.bf16.msra.mxu1 %v1145_v11  ;;  %v82_v36 = vld [vmem:[#allocation2 + $0x8] sm:$0xff]  ;;  %544 = vmatprep.mubr.bf16.mxu0 %v919_v33  ;;  %v1176_v45 = vld [vmem:[#allocation5 + $0x158] sm:$0xff]   ;;  %v1178_v47 = vld [vmem:[#allocation5 + $0x160] sm:$0xff]  }
  0x56   :  { %1021 = vmatprep.subr.bf16.mxu1 %v1148_v14  ;;  %v920_v37 = vcombine.low %v82_v36, %v82_v36  ;;  %v921_v38 = vcombine.high %v82_v36, %v82_v36  ;;  %v1172_v40 = vld [vmem:[#allocation5 + $0x148] sm:$0xff]   ;;  %v1174_v42 = vld [vmem:[#allocation5 + $0x150] sm:$0xff]   ;;  %v1177_v46 = vld [vmem:[#allocation5 + $0x118] sm:$0xff]  }
  0x57   :  { %1000 = vmatpush3.bf16.msra.mxu0 %v1147_v13  ;;  %v1173_v41 = vld [vmem:[#allocation5 + $0x108] sm:$0xff]   ;;  %v1175_v44 = vld [vmem:[#allocation5 + $0x110] sm:$0xff]   ;;  %v1179_v48 = vld [vmem:[#allocation5 + $0x120] sm:$0xff]  }
  0x58   :  { %1001 = vmatprep.subr.bf16.mxu0 %v1150_v16  ;;  %584 = vmatprep.mubr.bf16.mxu1 %v921_v38  ;;  %v1180_v49 = vld [vmem:[#allocation5 + $0x168] sm:$0xff]   ;;  %v1186_v50 = vld [vmem:[#allocation5 + $0x180] sm:$0xff]   ;;  %v83_v51 = vld [vmem:[#allocation2 + $0x10] sm:$0xff] }
  0x59   :  { %1022 = vmatpush3.bf16.msra.mxu1 %v1149_v15  ;;  %v1181_v52 = vld [vmem:[#allocation5 + $0x128] sm:$0xff]   ;;  %v923_v53 = vcombine.high %v83_v51, %v83_v51  ;;  %v1189_v54 = vld [vmem:[#allocation2 + $0x18] ss:$0 sps:$4 sm:$0xff]   ;;  %v1182_v55 = vld [vmem:[#allocation5 + $0x170] sm:$0xff]   ;;  %v922_v59 = vcombine.low %v83_v51, %v83_v51 }
  0x5a   :  { %1023 = vmatprep.subr.bf16.mxu1 %v1152_v18  ;;  %v1183_v56 = vld [vmem:[#allocation5 + $0x130] sm:$0xff]   ;;  %v1184_v57 = vld [vmem:[#allocation5 + $0x178] sm:$0xff]   ;;  %v1190_v60 = vld [vmem:[#allocation7] sm:$0xff]  }
  0x5b   :  { %1002 = vmatpush3.bf16.msra.mxu0 %v1151_v17  ;;  %v1185_v58 = vld [vmem:[#allocation5 + $0x138] sm:$0xff]   ;;  %v1191_v61 = vld [vmem:[#allocation7 + $0x8] sm:$0xff]   ;;  %v1193_v63 = vld [vmem:[#allocation7 + $0x18] sm:$0xff]  }
  0x5c   :  { %1003 = vmatprep.subr.bf16.mxu0 %v1154_v20  ;;  %v1192_v62 = vld [vmem:[#allocation7 + $0x10] sm:$0xff]   ;;  %v1194_v0 = vld [vmem:[#allocation7 + $0x20] sm:$0xff]   ;;  %v1195_v1 = vld [vmem:[#allocation7 + $0x28] sm:$0xff]  }
  0x5d   :  { %1024 = vmatpush3.bf16.msra.mxu1 %v1153_v19  ;;  %v1196_v2 = vld [vmem:[#allocation7 + $0x30] sm:$0xff]   ;;  %v1197_v3 = vld [vmem:[#allocation7 + $0x38] sm:$0xff]   ;;  %v1198_v4 = vld [vmem:[#allocation8] sm:$0xff]  }
  0x5e   :  { %1025 = vmatprep.subr.bf16.mxu1 %v1156_v22  ;;  %v1199_v5 = vld [vmem:[#allocation8 + $0x8] sm:$0xff]   ;;  %v1200_v6 = vld [vmem:[#allocation8 + $0x10] sm:$0xff]   ;;  %v1201_v7 = vld [vmem:[#allocation8 + $0x18] sm:$0xff]  }
  0x5f   :  { %1004 = vmatpush3.bf16.msra.mxu0 %v1155_v21  ;;  %v1202_v8 = vld [vmem:[#allocation8 + $0x20] sm:$0xff]   ;;  %v1203_v9 = vld [vmem:[#allocation8 + $0x28] sm:$0xff]   ;;  %v917_v11 = vld [vmem:[%s1476_s2] ss:$0 sm:$0xff] }
  0x60   :  { %1005 = vmatprep.subr.bf16.mxu0 %v1158_v24  ;;  %v1204_v36 = vld [vmem:[#allocation8 + $0x30] sm:$0xff]   ;;  %v975_v38 = vld [vmem:[%s1478_s4] ss:$0 sm:$0xff]  ;;  %s1294_s4 = scalar_lea.vmem %s907_s29, 64 }
  0x61   :  { %1026 = vmatpush3.bf16.msra.mxu1 %v1157_v23  ;;  %p1295_p4 = scmp.ne.s32.totalorder %s907_s29, %s1294_s4  ;;  %p1300_p6 = scmp.lt.s32.totalorder %s1294_s4, %s1294_s4 }
  0x62   :  { %1027 = vmatprep.subr.bf16.mxu1 %v1160_v26 }
  0x63   :  { %1006 = vmatpush3.bf16.msra.mxu0 %v1159_v25  ;;  %p1301_p7 = por %p1300_p6, %p1299_p5 }
  0x64   :  { %1007 = vmatprep.subr.bf16.mxu0 %v1162_v28 }
  0x65   :  { %1028 = vmatpush3.bf16.msra.mxu1 %v1161_v27  ;;  %p1302_p8 = pnand %p1301_p7, %p1295_p4 }
  0x66   :  { %1029 = vmatprep.subr.bf16.mxu1 %v1164_v30 }
  0x67   :  { %1008 = vmatpush3.bf16.msra.mxu0 %v1163_v29 }
  0x68   :  { %1037 = vmatprep.subr.bf16.mxu0 %v1168_v35 }
  0x69   :  { %1030 = vmatpush3.bf16.msra.mxu1 %v1167_v34 }
  0x6a   :  { %545 = vmatmul.mubr.bf16.vlgmr.msra.gmra.mrb[0].mxu0 %v918_v32  ;;  %1079 = vmatprep.subr.bf16.mxu1 %v1330_v43 }
  0x6b   :  { %1038 = vmatpush3.bf16.msra.mxu0 %v1171_v39  ;;  %624 = vmatprep.mubr.bf16.mxu0 %v923_v53 }
  0x6c   :  { %585 = vmatmul.mubr.bf16.vlgmr.msra.gmra.mrb[0].mxu1 %v920_v37  ;;  %1039 = vmatprep.subr.bf16.mxu0 %v1172_v40  ;;  %v1205_v37 = vld [vmem:[#allocation8 + $0x38] sm:$0xff]  }
  0x6d   :  { %1081 = vmatprep.mubr.msk.bf16.mxu1 %vm1331_vm0, %v1330_v43  ;;  %1080 = vmatpush3.bf16.msra.mxu1 %v1186_v50 }
  0x6e   :  { %1085 = vmatprep.subr.bf16.mxu1 %v1330_v43 }
  0x6f   :  { %1040 = vmatpush3.bf16.msra.mxu0 %v1173_v41 }
  0x70   :  { %1041 = vmatprep.subr.bf16.mxu0 %v1174_v42 }
  0x73   :  { %1042 = vmatpush3.bf16.msra.mxu0 %v1175_v44 }
  0x74   :  { %1043 = vmatprep.subr.bf16.mxu0 %v1176_v45  ;;  %1082 = vmatmul.mubr.msk.bf16.vlgmr.msra.gmra.mrb[4].mxu1 %vm508_vm1, %v1189_v54 }
  0x75   :  { %1101 = vmatprep.mubr.msk.bf16.mxu1 %vm1331_vm0, %v1330_v43  ;;  %1086 = vmatpush3.bf16.msra.mxu1 %v1190_v60 }
  0x76   :  { %1087 = vmatprep.subr.bf16.mxu1 %v1330_v43 }
  0x77   :  { %1044 = vmatpush3.bf16.msra.mxu0 %v1177_v46 }
  0x78   :  { %1045 = vmatprep.subr.bf16.mxu0 %v1178_v47  ;;  %v984_v47 = vld [vmem:[%s1480_s6] ss:$0 sm:$0xff] }
  0x79   :  { %1088 = vmatpush3.bf16.msra.mxu1 %v1191_v61 }
  0x7a   :  { %1089 = vmatprep.subr.bf16.mxu1 %v1330_v43 }
  0x7b   :  { %1046 = vmatpush3.bf16.msra.mxu0 %v1179_v48 }
  0x7c   :  { %1047 = vmatprep.subr.bf16.mxu0 %v1180_v49 }
  0x7d   :  { %1090 = vmatpush3.bf16.msra.mxu1 %v1192_v62 }
  0x7e   :  { %1091 = vmatprep.subr.bf16.mxu1 %v1330_v43 }
  0x7f   :  { %1048 = vmatpush3.bf16.msra.mxu0 %v1181_v52 }
  0x80   :  { %1049 = vmatprep.subr.bf16.mxu0 %v1182_v55 }
  0x81   :  { %1092 = vmatpush3.bf16.msra.mxu1 %v1193_v63 }
  0x82   :  { %1093 = vmatprep.subr.bf16.mxu1 %v1330_v43 }
  0x83   :  { %1050 = vmatpush3.bf16.msra.mxu0 %v1183_v56 }
  0x84   :  { %1051 = vmatprep.subr.bf16.mxu0 %v1184_v57 }
  0x85   :  { %1094 = vmatpush3.bf16.msra.mxu1 %v1194_v0 }
  0x86   :  { %1095 = vmatprep.subr.bf16.mxu1 %v1330_v43 }
  0x87   :  { %1052 = vmatpush3.bf16.msra.mxu0 %v1185_v58 }
  0x88   :  { %1105 = vmatprep.subr.bf16.mxu0 %v1330_v43 }
  0x89   :  { %1096 = vmatpush3.bf16.msra.mxu1 %v1195_v1 }
  0x8a   :  { %625 = vmatmul.mubr.bf16.vlgmr.msra.gmra.mrb[4].mxu0 %v922_v59  ;;  %1097 = vmatprep.subr.bf16.mxu1 %v1330_v43 }
  0x8b   :  { %1121 = vmatprep.mubr.msk.bf16.mxu0 %vm1331_vm0, %v1330_v43  ;;  %1106 = vmatpush3.bf16.msra.mxu0 %v1198_v4 }
  0x8c   :  { %1107 = vmatprep.subr.bf16.mxu0 %v1330_v43 }
  0x8d   :  { %1098 = vmatpush3.bf16.msra.mxu1 %v1196_v2 }
  0x8e   :  { %1099 = vmatprep.subr.bf16.mxu1 %v1330_v43 }
  0x8f   :  { %1108 = vmatpush3.bf16.msra.mxu0 %v1199_v5 }
  0x90   :  { %1109 = vmatprep.subr.bf16.mxu0 %v1330_v43 }
  0x91   :  { %1100 = vmatpush3.bf16.msra.mxu1 %v1197_v3 }
  0x93   :  { %1110 = vmatpush3.bf16.msra.mxu0 %v1200_v6 }
  0x94   :  { %1111 = vmatprep.subr.bf16.mxu0 %v1330_v43 }
  0x97   :  { %1112 = vmatpush3.bf16.msra.mxu0 %v1201_v7 }
  0x98   :  { %1113 = vmatprep.subr.bf16.mxu0 %v1330_v43 }
  0x9b   :  { %1114 = vmatpush3.bf16.msra.mxu0 %v1202_v8 }
  0x9c   :  { %1115 = vmatprep.subr.bf16.mxu0 %v1330_v43 }
  0x9f   :  { %1116 = vmatpush3.bf16.msra.mxu0 %v1203_v9 }
  0xa0   :  { %1117 = vmatprep.subr.bf16.mxu0 %v1330_v43 }
  0xa3   :  { %1118 = vmatpush3.bf16.msra.mxu0 %v1204_v36 }
  0xa4   :  { %1119 = vmatprep.subr.bf16.mxu0 %v1330_v43 }
  0xa7   :  { %1120 = vmatpush3.bf16.msra.mxu0 %v1205_v37 }
 0x13d   :  { %v1009_v10 = vpop.f32.mrb[0].mxu0 }
 0x13e   :  { %v1010_v12 = vpop.f32.mrb[1].mxu0 }
 0x13f   :  { %v1011_v13 = vadd.f32 %v1010_v12, %v1009_v10  ;;  %v1012_v14 = vpop.f32.mrb[2].mxu0  ;;  %v1031_v15 = vpop.f32.mrb[0].mxu1 }
 0x140   :  { %v1013_v16 = vpop.f32.mrb[3].mxu0  ;;  %v1032_v17 = vpop.f32.mrb[1].mxu1 }
 0x141   :  { %v547_v18 = vadd.f32 %v1011_v13, %v917_v11  ;;  %v1033_v19 = vadd.f32 %v1032_v17, %v1031_v15  ;;  %v1034_v20 = vpop.f32.mrb[2].mxu1 }
 0x142   :  { %v1035_v21 = vpop.f32.mrb[3].mxu1 }
 0x143   :  { %v587_v22 = vadd.f32 %v1033_v19, %v547_v18 }
 0x147   :  { %v666_v23 = vpop.f32.mrb[4].mxu1 }
 0x148   :  { %v1083_v24 = vpop.f32.mrb[5].mxu1 }
 0x149   :  { %v669_v25 = vpop.f32.mrb[6].mxu1 }
 0x14a   :  { %v1084_v26 = vpop.f32.mrb[7].mxu1 }
 0x15d   :  { %v1053_v27 = vpop.f32.mrb[4].mxu0 }
 0x15e   :  { %v1054_v28 = vpop.f32.mrb[5].mxu0 }
 0x15f   :  { %v1055_v29 = vadd.f32 %v1054_v28, %v1053_v27  ;;  %v1056_v30 = vpop.f32.mrb[6].mxu0 }
 0x160   :  { %v1057_v31 = vpop.f32.mrb[7].mxu0 }
 0x161   :  { %v627_v32 = vadd.f32 %v1055_v29, %v587_v22 }
 0x163   :  { %v667_v33 = vadd.f32 %v666_v23, %v627_v32 }
 0x165   :  { %v672_v34 = vmax.f32 %v667_v33, 0.0 }
 0x167   :  { %v673_v35 = vpack.c.bf16 %v672_v34, %v672_v34 }
 0x169   :  { %1102 = vmatmul.mubr.bf16.vlgmr.msra.gmra.mrb[8].mxu1 %v673_v35 }
 0x23c   :  { %v779_v39 = vpop.f32.mrb[8].mxu1 }
 0x23d   :  { %v780_v40 = vadd.f32 %v975_v38, %v779_v39  ;;  %v1103_v41 = vpop.f32.mrb[9].mxu1 }
 0x23e   :  { %v782_v42 = vpop.f32.mrb[10].mxu1 }
 0x23f   :  { %v785_v44 = vmax.f32 %v780_v40, 0.0  ;;  %v1104_v45 = vpop.f32.mrb[11].mxu1 }
 0x241   :  { %v786_v46 = vpack.c.bf16 %v785_v44, %v785_v44 }
 0x243   :  { %1122 = vmatmul.mubr.bf16.vlgmr.msra.gmra.mrb[8].mxu0 %v786_v46 }
 0x316   :  { %v892_v48 = vpop.f32.mrb[8].mxu0 }
 0x317   :  { %v893_v43 = vadd.f32 %v984_v47, %v892_v48  ;;  %v1123_v49 = vpop.f32.mrb[9].mxu0 }
 0x318   :  { %v895_v50 = vpop.f32.mrb[10].mxu0 }
 0x319   :  { %v898_v51 = vpack.c.bf16 %v893_v43, %v893_v43  ;;  %v1124_v52 = vpop.f32.mrb[11].mxu0 }
 0x31b   :  { %899 = vst [vmem:[#allocation10] sm:$0xf] %v898_v51 }
 0x31c   :  { %1305 = shalt.err (!%p1302_p8)
}
 0x31d   :  { %s1306_s6 = scalar_lea.hbm %s1481_s7, 64 }
 0x31e   :  { %p1307_p9 = scmp.ne.s32.totalorder %s1481_s7, %s1306_s6  ;;  %p1310_p10 = scmp.lt.u32.totalorder %s1306_s6, %s1481_s7 }
 0x320   :  { %p1312_p11 = pnand %p1310_p10, %p1307_p9 }
 0x322   :  { %1315 = shalt.err (!%p1312_p11)
}
 0x323   :  { %909 = dma.vmem_to_hbm [thread:$0]  %s907_s29, 64, %s1481_s7, [#allocation4]  }
 0x324   :  { %1322 = dma.done.wait [#allocation4], 64  }
 0x325   :  { %1323 = vsyncadd [#allocation4], 4294967232 }
 0x326   :  { %913 = vsyncpa [#allocation3], 1 }
 0x327   :  { %914 = vsyncpa [#allocation6], 1 }
 0x328   :  { %915 = vsyncpa [#allocation9], 1 }
 0x329   :  { %916 = vsyncpa [#allocation4], 1 }

</bundles_post_ra>
